<compile_context>
chip_gen: v7x
topology: tpu7x:2x2x1
jax: 0.10.0
libtpu: 0.0.40
codegen_flags: <defaults>
</compile_context>

<pallas_src>
import jax
import jax.numpy as jnp
from jax import lax
from jax.experimental import pallas as pl
from jax.experimental.pallas import tpu as pltpu

_LANES = 128
_SUBLANES = 8
# Per-input, per-buffer element cap: keeps the Mosaic elementwise unroll to
# ~2k vregs (comparable to known-good large streaming tiles).
_MAX_BLOCK_ELEMS = 2 * 1024 * 1024


def _round_up(x, m):
    return ((x + m - 1) // m) * m


def _vmem_capacity_bytes():
    try:
        cap = getattr(pltpu.get_tpu_info(), "vmem_capacity_bytes", None)
        if cap:
            return int(cap)
    except Exception:
        pass
    return 128 * 1024 * 1024


def _make_dice_kernel(C, TR, R, ragged):
    """Kernel factory; C / TR / R / ragged are static (closed over)."""

    def kernel(pred_ref, targ_ref, acc_ref):
        # pred_ref / targ_ref block: (1, C, TR, 128) -- channel axis sits
        # OUTSIDE the last two dims, so the softmax is pure vreg-wise VPU/EUP.
        # acc_ref block: (1, 2*C, 8, 128), resident across the k grid axis.
        k = pl.program_id(1)

        @pl.when(k == 0)
        def _init():
            acc_ref[...] = jnp.zeros_like(acc_ref)

        logits = pred_ref[0].astype(jnp.float32)         # (C, TR, 128)
        t = targ_ref[0].astype(jnp.float32)              # (C, TR, 128)

        if ragged:
            # Only the last k block is partial; rows >= R hold stale VMEM
            # bytes.  Zero them BEFORE exp so garbage can't become inf/NaN.
            # Zeroed rows then contribute exactly p = 1/C, t = 0, which the
            # epilogue removes analytically from `den` (no mask on p needed).
            row = k * TR + lax.broadcasted_iota(jnp.int32, (TR, _LANES), 0)
            valid = (row < R)[None, :, :]                # (1, TR, 128)
            logits = jnp.where(valid, logits, 0.0)
            t = jnp.where(valid, t, 0.0)

        # Channel softmax (axis 0): plain vreg-wise max/sub/exp/sum/mul.
        m = jnp.max(logits, axis=0, keepdims=True)        # (1, TR, 128)
        e = jnp.exp(logits - m)                           # (C, TR, 128)
        z = jnp.sum(e, axis=0, keepdims=True)             # (1, TR, 128)
        # approx=False keeps bit-level parity with the reference softmax.
        p = e * pl.reciprocal(z, approx=False)            # (C, TR, 128)

        num_p = p * t                                     # (C, TR, 128)
        den_p = p * p + t * t                             # (C, TR, 128)

        # Fold TR rows to one (8,128) slab per channel with vreg-wise adds
        # (layout-free reshape); cross-lane/sublane reduce runs once in JAX.
        num_8 = num_p.reshape(C, TR // _SUBLANES, _SUBLANES, _LANES).sum(axis=1)
        den_8 = den_p.reshape(C, TR // _SUBLANES, _SUBLANES, _LANES).sum(axis=1)

        acc_ref[0, :C] += num_8
        acc_ref[0, C:] += den_8

    return kernel


def dice_loss(predict, target, smooth=1.0, weight=None, ignore_index=None,
              block_rows=None):
    """Equivalent of DiceLoss(weight, ignore_index)(predict, target) with
    BinaryDiceLoss defaults (smooth=1, p=2, reduction='mean').

    `target` may be any dtype (e.g. bf16/int8 one-hot to cut HBM traffic);
    both inputs are upcast to f32 inside the kernel after the VMEM load."""
    assert predict.shape == target.shape, "predict & target shape do not match"
    N, C = predict.shape[0], predict.shape[1]
    S = 1
    for d in predict.shape[2:]:
        S *= d

    pred = predict.reshape(N, C, S)
    targ = target.reshape(N, C, S)

    # Pad only to the 128-lane boundary (rare: S % 128 != 0) so the
    # (N, C, R, 128) reshape below is a zero-copy bitcast.  All other tail
    # handling (R % TR != 0) is done in-kernel on partial blocks -- no copy.
    if S % _LANES != 0:
        pad = _LANES - S % _LANES
        pred = jnp.pad(pred, ((0, 0), (0, 0), (0, pad)))
        targ = jnp.pad(targ, ((0, 0), (0, 0), (0, pad)))
    R = pred.shape[2] // _LANES
    pred = pred.reshape(N, C, R, _LANES)
    targ = targ.reshape(N, C, R, _LANES)

    pb = jnp.dtype(pred.dtype).itemsize
    tb = jnp.dtype(targ.dtype).itemsize

    # ---- spatial row tile TR, derived from the chip's VMEM capacity -------
    vmem_cap = _vmem_capacity_bytes()
    input_budget = min(vmem_cap // 4, 32 * 1024 * 1024)   # double-buffered in
    if block_rows is None:
        tr_bytes = input_budget // (2 * C * _LANES * (pb + tb))
        tr_elems = _MAX_BLOCK_ELEMS // (C * _LANES)
        TR = max(_SUBLANES,
                 (min(tr_bytes, tr_elems) // _SUBLANES) * _SUBLANES)
    else:
        assert block_rows % _SUBLANES == 0
        TR = block_rows
    TR = min(TR, _round_up(R, _SUBLANES))
    num_k = pl.cdiv(R, TR)
    ragged = (R % TR) != 0

    actual_in_bytes = 2 * C * TR * _LANES * (pb + tb)
    vmem_limit = min(vmem_cap * 3 // 4,
                     max(2 * input_budget, actual_in_bytes + (8 << 20)))

    acc = pl.pallas_call(
        _make_dice_kernel(C, TR, R, ragged),
        grid=(N, num_k),
        in_specs=[
            pl.BlockSpec((1, C, TR, _LANES), lambda n, k: (n, 0, k, 0)),
            pl.BlockSpec((1, C, TR, _LANES), lambda n, k: (n, 0, k, 0)),
        ],
        out_specs=pl.BlockSpec((1, 2 * C, _SUBLANES, _LANES),
                               lambda n, k: (n, 0, 0, 0)),
        out_shape=jax.ShapeDtypeStruct((N, 2 * C, _SUBLANES, _LANES),
                                       jnp.float32),
        compiler_params=pltpu.CompilerParams(
            dimension_semantics=("parallel", "arbitrary"),
            vmem_limit_bytes=int(vmem_limit),
        ),
    )(pred, targ)

    # Tiny O(N*C) epilogue: final lane/sublane reduce + dice glue.
    sums = jnp.sum(acc, axis=(2, 3))               # (N, 2C)
    num = sums[:, :C] + smooth
    # Every padded / masked-tail position contributed exactly p=1/C, t=0.
    pad_elems = num_k * TR * _LANES - S
    den = sums[:, C:] - pad_elems / float(C * C) + smooth
    loss_nc = 1.0 - num / den                      # per-batch, per-class dice
    per_class = jnp.mean(loss_nc, axis=0)          # BinaryDiceLoss 'mean'
    if weight is not None:
        per_class = per_class * jnp.asarray(weight, dtype=per_class.dtype)
    if ignore_index is not None:
        keep = jnp.ones((C,), per_class.dtype).at[ignore_index].set(0.0)
        per_class = per_class * keep
    return jnp.sum(per_class) / C


def _reference(predict, target, smooth=1.0):
    # pure-JAX reference for sanity checking
    N, C = predict.shape[0], predict.shape[1]
    p = jax.nn.softmax(predict.astype(jnp.float32), axis=1).reshape(N, C, -1)
    t = target.astype(jnp.float32).reshape(N, C, -1)
    num = jnp.sum(p * t, axis=2) + smooth
    den = jnp.sum(p * p + t * t, axis=2) + smooth
    loss = 1.0 - num / den
    return jnp.sum(jnp.mean(loss, axis=0)) / C


def _check(predict, target, **kw):
    out = jax.block_until_ready(dice_loss(predict, target, **kw))
    ref = jax.block_until_ready(_reference(predict, target))
    assert jnp.allclose(out, ref, atol=1e-5, rtol=1e-5), (out, ref)


if __name__ == "__main__":
    key = jax.random.PRNGKey(0)
    k1, k2 = jax.random.split(key)
    N, C = 2, 4

    def make(hw):
        h, w = hw
        pr = jax.random.normal(k1, (N, C, h, w), dtype=jnp.float32)
        lb = jax.random.randint(k2, (N, h, w), 0, C)
        tg = jax.nn.one_hot(lb, C, axis=1, dtype=jnp.float32)  # (N, C, h, w)
        return pr, tg

    # Primary shape (ragged last block: R=2 rows, TR=8).
    p0, t0 = make((16, 16))
    _check(p0, t0)

    # Non-ragged path (R=8, single full block, no masking code emitted).
    p1, t1 = make((32, 32))
    _check(p1, t1)

    # Multi-block + ragged tail (forced small tile: R=18, TR=8, num_k=3).
    p2, t2 = make((48, 48))
    _check(p2, t2, block_rows=8)

    # S % 128 != 0 fallback (wrapper pads only to the lane boundary).
    p3, t3 = make((15, 15))
    _check(p3, t3)

    print("KERNEL_OK")
</pallas_src>

<mosaic_0001>
module attributes {stable_mosaic.version = 11 : i64} {
  func.func @kernel(%arg0: i32, %arg1: i32, %arg2: memref<1x4x8x128xf32, #tpu.memory_space<vmem>>, %arg3: memref<1x4x8x128xf32, #tpu.memory_space<vmem>>, %arg4: memref<1x8x8x128xf32, #tpu.memory_space<vmem>>) attributes {dimension_semantics = [#tpu.dimension_semantics<parallel>, #tpu.dimension_semantics<arbitrary>], iteration_bounds = array<i64: 2, 1>, scalar_prefetch = 0 : i64, scratch_operands = 0 : i64, tpu.core_type = #tpu.core_type<tc>, window_params = [{transform_indices = @transform_0, window_bounds = array<i64: 1, 4, 8, 128>}, {transform_indices = @transform_1, window_bounds = array<i64: 1, 4, 8, 128>}, {transform_indices = @transform_2, window_bounds = array<i64: 1, 8, 8, 128>}]} {
    %c0_i32 = arith.constant 0 : i32
    %0 = arith.cmpi eq, %arg1, %c0_i32 : i32
    %1 = arith.extui %0 : i1 to i32
    %c0_i32_0 = arith.constant 0 : i32
    %2 = arith.cmpi ne, %1, %c0_i32_0 : i32
    scf.if %2 {
      %cst_28 = arith.constant 0.000000e+00 : f32
      %52 = vector.broadcast %cst_28 : f32 to vector<1x8x8x128xf32>
      %c0_29 = arith.constant 0 : index
      %c0_30 = arith.constant 0 : index
      %c0_31 = arith.constant 0 : index
      %c0_32 = arith.constant 0 : index
      %53 = vector.load %arg4[%c0_29, %c0_30, %c0_31, %c0_32] : memref<1x8x8x128xf32, #tpu.memory_space<vmem>>, vector<1x8x8x128xf32>
      tpu.vector_store %arg4[%c0_29, %c0_30, %c0_31, %c0_32], %52 {strides = array<i32>} : memref<1x8x8x128xf32, #tpu.memory_space<vmem>>, vector<1x8x8x128xf32>,
    } else {
    }
    %c0 = arith.constant 0 : index
    %c0_1 = arith.constant 0 : index
    %c0_2 = arith.constant 0 : index
    %c0_3 = arith.constant 0 : index
    %3 = vector.load %arg2[%c0, %c0_1, %c0_2, %c0_3] : memref<1x4x8x128xf32, #tpu.memory_space<vmem>>, vector<1x4x8x128xf32>
    %4 = vector.shape_cast %3 : vector<1x4x8x128xf32> to vector<4x8x128xf32>
    %c0_4 = arith.constant 0 : index
    %c0_5 = arith.constant 0 : index
    %c0_6 = arith.constant 0 : index
    %c0_7 = arith.constant 0 : index
    %5 = vector.load %arg3[%c0_4, %c0_5, %c0_6, %c0_7] : memref<1x4x8x128xf32, #tpu.memory_space<vmem>>, vector<1x4x8x128xf32>
    %6 = vector.shape_cast %5 : vector<1x4x8x128xf32> to vector<4x8x128xf32>
    %c8_i32 = arith.constant 8 : i32
    %7 = arith.muli %arg1, %c8_i32 : i32
    %8 = tpu.iota {dimensions = array<i32: 0>} : vector<8x128xi32>
    %9 = vector.broadcast %7 : i32 to vector<8x128xi32>
    %10 = arith.addi %9, %8 : vector<8x128xi32>
    %c2_i32 = arith.constant 2 : i32
    %11 = vector.broadcast %c2_i32 : i32 to vector<8x128xi32>
    %12 = arith.cmpi slt, %10, %11 : vector<8x128xi32>
    %13 = vector.shape_cast %12 : vector<8x128xi1> to vector<1x8x128xi1>
    %cst = arith.constant 0.000000e+00 : f32
    %14 = vector.shape_cast %13 : vector<1x8x128xi1> to vector<1x8x128xi1>
    %15 = vector.broadcast %14 : vector<1x8x128xi1> to vector<4x8x128xi1>
    %16 = vector.broadcast %cst : f32 to vector<4x8x128xf32>
    %17 = arith.select %15, %4, %16 : vector<4x8x128xi1>, vector<4x8x128xf32>
    %cst_8 = arith.constant 0.000000e+00 : f32
    %18 = vector.shape_cast %13 : vector<1x8x128xi1> to vector<1x8x128xi1>
    %19 = vector.broadcast %18 : vector<1x8x128xi1> to vector<4x8x128xi1>
    %20 = vector.broadcast %cst_8 : f32 to vector<4x8x128xf32>
    %21 = arith.select %19, %6, %20 : vector<4x8x128xi1>, vector<4x8x128xf32>
    %cst_9 = arith.constant dense<0xFF800000> : vector<8x128xf32>
    %22 = vector.multi_reduction <maximumf>, %17, %cst_9 [0] : vector<4x8x128xf32> to vector<8x128xf32>
    %23 = vector.shape_cast %22 : vector<8x128xf32> to vector<1x8x128xf32>
    %24 = vector.broadcast %23 : vector<1x8x128xf32> to vector<4x8x128xf32>
    %25 = arith.subf %17, %24 : vector<4x8x128xf32>
    %26 = math.exp %25 : vector<4x8x128xf32>
    %cst_10 = arith.constant dense<0.000000e+00> : vector<8x128xf32>
    %27 = vector.multi_reduction <add>, %26, %cst_10 [0] : vector<4x8x128xf32> to vector<8x128xf32>
    %28 = vector.shape_cast %27 : vector<8x128xf32> to vector<1x8x128xf32>
    %29 = tpu.reciprocal %28 : vector<1x8x128xf32> -> vector<1x8x128xf32>
    %30 = vector.broadcast %29 : vector<1x8x128xf32> to vector<4x8x128xf32>
    %31 = arith.mulf %26, %30 : vector<4x8x128xf32>
    %32 = arith.mulf %31, %21 : vector<4x8x128xf32>
    %33 = arith.mulf %31, %31 : vector<4x8x128xf32>
    %34 = arith.mulf %21, %21 : vector<4x8x128xf32>
    %35 = arith.addf %33, %34 : vector<4x8x128xf32>
    %36 = vector.shape_cast %32 : vector<4x8x128xf32> to vector<4x1x8x128xf32>
    %cst_11 = arith.constant dense<0.000000e+00> : vector<4x8x128xf32>
    %37 = vector.multi_reduction <add>, %36, %cst_11 [1] : vector<4x1x8x128xf32> to vector<4x8x128xf32>
    %38 = vector.shape_cast %35 : vector<4x8x128xf32> to vector<4x1x8x128xf32>
    %cst_12 = arith.constant dense<0.000000e+00> : vector<4x8x128xf32>
    %39 = vector.multi_reduction <add>, %38, %cst_12 [1] : vector<4x1x8x128xf32> to vector<4x8x128xf32>
    %c0_13 = arith.constant 0 : index
    %c0_14 = arith.constant 0 : index
    %c0_15 = arith.constant 0 : index
    %c0_16 = arith.constant 0 : index
    %40 = vector.load %arg4[%c0_13, %c0_14, %c0_15, %c0_16] : memref<1x8x8x128xf32, #tpu.memory_space<vmem>>, vector<1x4x8x128xf32>
    %41 = vector.shape_cast %40 : vector<1x4x8x128xf32> to vector<4x8x128xf32>
    %42 = arith.addf %41, %37 : vector<4x8x128xf32>
    %c0_17 = arith.constant 0 : index
    %c0_18 = arith.constant 0 : index
    %c0_19 = arith.constant 0 : index
    %c0_20 = arith.constant 0 : index
    %43 = vector.load %arg4[%c0_17, %c0_18, %c0_19, %c0_20] : memref<1x8x8x128xf32, #tpu.memory_space<vmem>>, vector<1x4x8x128xf32>
    %44 = vector.shape_cast %43 : vector<1x4x8x128xf32> to vector<4x8x128xf32>
    %45 = vector.shape_cast %42 : vector<4x8x128xf32> to vector<1x4x8x128xf32>
    tpu.vector_store %arg4[%c0_17, %c0_18, %c0_19, %c0_20], %45 {strides = array<i32>} : memref<1x8x8x128xf32, #tpu.memory_space<vmem>>, vector<1x4x8x128xf32>,
    %c0_21 = arith.constant 0 : index
    %c4 = arith.constant 4 : index
    %c0_22 = arith.constant 0 : index
    %c0_23 = arith.constant 0 : index
    %46 = vector.load %arg4[%c0_21, %c4, %c0_22, %c0_23] : memref<1x8x8x128xf32, #tpu.memory_space<vmem>>, vector<1x4x8x128xf32>
    %47 = vector.shape_cast %46 : vector<1x4x8x128xf32> to vector<4x8x128xf32>
    %48 = arith.addf %47, %39 : vector<4x8x128xf32>
    %c0_24 = arith.constant 0 : index
    %c4_25 = arith.constant 4 : index
    %c0_26 = arith.constant 0 : index
    %c0_27 = arith.constant 0 : index
    %49 = vector.load %arg4[%c0_24, %c4_25, %c0_26, %c0_27] : memref<1x8x8x128xf32, #tpu.memory_space<vmem>>, vector<1x4x8x128xf32>
    %50 = vector.shape_cast %49 : vector<1x4x8x128xf32> to vector<4x8x128xf32>
    %51 = vector.shape_cast %48 : vector<4x8x128xf32> to vector<1x4x8x128xf32>
    tpu.vector_store %arg4[%c0_24, %c4_25, %c0_26, %c0_27], %51 {strides = array<i32>} : memref<1x8x8x128xf32, #tpu.memory_space<vmem>>, vector<1x4x8x128xf32>,
    return
  }
  func.func @transform_0(%arg0: i32, %arg1: i32) -> (i32, i32, i32, i32) {
    %c0_i32 = arith.constant 0 : i32
    %c0_i32_0 = arith.constant 0 : i32
    %c0_i32_1 = arith.constant 0 : i32
    return %arg0, %c0_i32, %arg1, %c0_i32_0 : i32, i32, i32, i32
  }
  func.func @transform_1(%arg0: i32, %arg1: i32) -> (i32, i32, i32, i32) {
    %c0_i32 = arith.constant 0 : i32
    %c0_i32_0 = arith.constant 0 : i32
    %c0_i32_1 = arith.constant 0 : i32
    return %arg0, %c0_i32, %arg1, %c0_i32_0 : i32, i32, i32, i32
  }
  func.func @transform_2(%arg0: i32, %arg1: i32) -> (i32, i32, i32, i32) {
    %c0_i32 = arith.constant 0 : i32
    %c0_i32_0 = arith.constant 0 : i32
    %c0_i32_1 = arith.constant 0 : i32
    %c0_i32_2 = arith.constant 0 : i32
    return %arg0, %c0_i32, %c0_i32_0, %c0_i32_1 : i32, i32, i32, i32
  }
}

</mosaic_0001>

<bundles_post_ra>
// kernel: tpu_custom_call.1
= control target key start
LH: loop header
LB: loop body
LE: loop exit
PB: predicated region body
PF: predicated region fallthrough
CT: control target
= control target key end

     0   :  { %7 = vsyncpa [#allocation3], 0  ;;  %s915_s0 = inlined_call_operand.hbm [shape: f32[2,4,2,128], index: 0, kind: input, shape index: {}]   ;;  %s916_s1 = inlined_call_operand.hbm [shape: f32[2,4,2,128], index: 1, kind: input, shape index: {}]   ;;  %s917_s2 = inlined_call_operand.hbm [shape: f32[2,8,8,128], index: 2, kind: output, shape index: {}]  }
   0x1   :  { %9 = vsyncpa [#allocation3 + $0x1], 0 }
   0x2   :  { %10 = vsyncpa [#allocation6], 0 }
   0x3   :  { %12 = vsyncpa [#allocation6 + $0x1], 0 }
   0x4   :  { %13 = vsyncpa [#allocation4], 0 }
   0x5   :  { %15 = vsyncpa [#allocation4 + $0x1], 0  ;;  %s750_s9 = smov 0   ;;  %s752_s10 = smov 0  }
   0x6   :  { %s754_s11 = smov 0   ;;  %s756_s12 = smov 0  }
   0x7   :  { %s758_s13 = smov 0   ;;  %s760_s14 = smov 0  }
   0x8 LB: > { %s520_s15 = sadd.s32 4294967295, %s720_s14   ;;  %s521_s16 = sadd.s32 4294967294, %s720_s14   ;;  %s720_s14 = sphi %s760_s14, %s21_s14   ;;  %s716_s13 = sphi %s758_s13, %s926_s13   ;;  %s712_s12 = sphi %s756_s12, %s925_s12   ;;  %s708_s11 = sphi %s754_s11, %s924_s11   ;;  %s704_s10 = sphi %s752_s10, %s923_s10   ;;  %s700_s9 = sphi %s750_s9, %s922_s9  }
   0x9   : > { %s33_s17 = sadd.s32 1, %s716_s13  ;;  %s42_s18 = sadd.s32 1, %s708_s11 }
   0xa   : > { %p35_p0 = scmp.ge.s32.totalorder %s33_s17, 2  ;;  %p49_p1 = scmp.ne.s32.totalorder %s708_s11, %s704_s10 }
   0xb   : > { %p50_p2 = scmp.eq.s32.totalorder %s720_s14, 0  ;;  %p55_p3 = scmp.ne.s32.totalorder %s704_s10, %s700_s9 }
   0xc   : > { %s928_s17 = smov (%p35_p0, %s33_s17), 0  ;;  %p56_p5 = scmp.eq.s32.totalorder %s520_s15, 0 }
   0xd   : > { %p791_p4 = por %p50_p2, %p49_p1  ;;  %s37_s20 = ssub.s32 %s716_s13, %s928_s17 }
   0xe   : > { %p107_p6 = scmp.eq.s32.totalorder %s520_s15, 1  ;;  %p40_p7 = scmp.eq.s32.totalorder %s37_s20, 0 }
   0xf   : > { %p797_p8 = por %p56_p5, %p55_p3  ;;  %p113_p10 = scmp.eq.s32.totalorder %s521_s16, 1 }
  0x10   : > { %p801_p9 = por %p107_p6, %p49_p1  ;;  %p523_p12 = scmp.ge.s32.totalorder %s720_s14, 2 }
  0x11   : > { %s806_s23 = scalar_select %p40_p7, %s708_s11, %s42_s18  }
  0x12   : > { %p808_p11 = por %p113_p10, %p55_p3  ;;  %129 = sbr.rel (%p523_p12) target bundleno = 65 (0x41), region = 16 }
  0x19   : > { %132 = sbr.rel (!%p791_p4) target bundleno = 45 (0x2d), region = 20 }
  0x20   : > { %s133_s25 = sand.u32 1, %s708_s11  }
  0x21   : > { %s524_s26 = sshll.u32 %s133_s25, 5  ;;  %s134_s27 = scalar_lea.sflag [#allocation3], %s133_s25 }
  0x22   : > { %s137_s28 = scalar_lea.vmem [#allocation2], %s524_s26 }
  0x23   : > { %143 = vsyncadd %s134_s27, 384  ;;  %s551_s29 = sshll.u32 %s716_s13, 7  ;;  %s155_s30 = sld [smem:[#allocation0]]  }
  0x24   : > { %s148_s5 = scalar_lea.hbm %s915_s0, %s551_s29  ;;  %s163_s6 = sshll.u32 %s137_s28, 4  ;;  %s164_s6 = int_to_ptr.vmem [resolvable:$true] %s163_s6 }
  0x25   : > { %s722_s7 = smov 32   ;;  %s723_s8 = smov 128  }
  0x26   : > { %170 = sst [smem:[#allocation9]] %s722_s7  ;;  %s724_s15 = smov 1  }
  0x27   : > { %172 = sst [smem:[#allocation9 + $0x1]] %s723_s8  ;;  %s725_s20 = smov 2  }
  0x28   : > { %174 = sst [smem:[#allocation9 + $0x2]] %s724_s15  ;;  %s726_s25 = smov [#allocation8]  }
  0x29   : > { %s527_s16 = sshll.u32 %s155_s30, 26  ;;  %176 = sst [smem:[#allocation9 + $0x3]] %s722_s7 }
  0x2a   : > { %s528_s18 = sadd.s32 134217728, %s527_s16  ;;  %178 = sst [smem:[#allocation9 + $0x4]] %s722_s7 }
  0x2b   : > { %180 = sst [smem:[#allocation9 + $0x5]] %s725_s20 }
  0x2c   : > { %182 = dma.general %s148_s5, 128, %s164_s6, %s134_s27, %s726_s25, [#allocation9], %s528_s18, 0  }
  0x2d PF: > { %185 = sbr.rel (!%p791_p4) target bundleno = 65 (0x41), region = 24 }
  0x34   : > { %s186_s26 = sand.u32 1, %s708_s11  }
  0x35   : > { %s529_s28 = sshll.u32 %s186_s26, 5  ;;  %s187_s29 = scalar_lea.sflag [#allocation6], %s186_s26 }
  0x36   : > { %s190_s3 = scalar_lea.vmem [#allocation5], %s529_s28 }
  0x37   : > { %196 = vsyncadd %s187_s29, 384  ;;  %s552_s4 = sshll.u32 %s716_s13, 7  ;;  %s208_s30 = sld [smem:[#allocation0]]  }
  0x38   : > { %s201_s7 = scalar_lea.hbm %s916_s1, %s552_s4  ;;  %s216_s16 = sshll.u32 %s190_s3, 4  ;;  %s217_s16 = int_to_ptr.vmem [resolvable:$true] %s216_s16 }
  0x39   : > { %s727_s27 = smov 32   ;;  %s728_s5 = smov 128  }
  0x3a   : > { %223 = sst [smem:[#allocation11]] %s727_s27  ;;  %s729_s19 = smov 1  }
  0x3b   : > { %225 = sst [smem:[#allocation11 + $0x1]] %s728_s5  ;;  %s730_s20 = smov 2  }
  0x3c   : > { %227 = sst [smem:[#allocation11 + $0x2]] %s729_s19  ;;  %s731_s25 = smov [#allocation10]  }
  0x3d   : > { %s532_s6 = sshll.u32 %s208_s30, 26  ;;  %229 = sst [smem:[#allocation11 + $0x3]] %s727_s27 }
  0x3e   : > { %s533_s18 = sadd.s32 134217728, %s532_s6  ;;  %231 = sst [smem:[#allocation11 + $0x4]] %s727_s27 }
  0x3f   : > { %233 = sst [smem:[#allocation11 + $0x5]] %s730_s20 }
  0x40   : > { %235 = dma.general %s201_s7, 128, %s217_s16, %s187_s29, %s731_s25, [#allocation11], %s533_s18, 0  }
  0x41 PF: > { %p534_p13 = scmp.ge.s32.totalorder %s720_s14, 1  ;;  %p237_p0 = scmp.lt.s32.totalorder %s720_s14, 3 }
  0x43   : > { %p238_p1 = pnand %p534_p13, %p237_p0 }
  0x44   : > { %s832_s26 = sand.u32 (!%p238_p1), 1, %s704_s10  }
  0x45   : > { %241 = sbr.rel (%p238_p1) target bundleno = 145 (0x91), region = 28  ;;  %s535_s28 = sshll.u32 (!%p238_p1), %s832_s26, 5 }
  0x46   : > { %s244_s3 = scalar_lea.sflag (!%p238_p1), [#allocation3], %s832_s26  ;;  %s247_s4 = scalar_lea.vmem (!%p238_p1), [#allocation2], %s535_s28 }
  0x4c   : > { %687 = dma.done.wait (%p797_p8), %s244_s3, 512  }
  0x4d   : > { %689 = vsyncadd (%p797_p8), %s244_s3, 4294966784  ;;  %s253_s29 = scalar_lea.sflag [#allocation6], %s832_s26  ;;  %s841_s30 = scalar_lea.vmem [#allocation5], %s535_s28 }
  0x4e   : > { %691 = dma.done.wait (%p797_p8), %s253_s29, 512  }
  0x4f   : > { %693 = vsyncadd (%p797_p8), %s253_s29, 4294966784  ;;  %v309_v0 = vlaneseq  ;;  %v300_v2 = vld [vmem:[%s247_s4] sm:$0xff]  ;;  %v301_v3 = vld [vmem:[%s247_s4 + $0x8] sm:$0xff]  ;;  %s537_s21 = sshll.u32 %s832_s26, 6  ;;  %s553_s8 = sshll.u32 %s712_s12, 10 }
  0x50   : > { %v302_v4 = vld [vmem:[%s247_s4 + $0x10] sm:$0xff]  ;;  %v303_v5 = vld [vmem:[%s247_s4 + $0x18] sm:$0xff]  ;;  %v304_v28 = vld [vmem:[%s841_s30] sm:$0xff]  ;;  %s281_s15 = scalar_lea.vmem [#allocation7], %s537_s21  ;;  %s864_s5 = scalar_lea.hbm %s917_s2, %s553_s8 }
  0x51   : > { %v310_v1 = vshrl.u32 %v309_v0, 7  ;;  %v305_v29 = vld [vmem:[%s841_s30 + $0x8] sm:$0xff]  ;;  %v306_v30 = vld [vmem:[%s841_s30 + $0x10] sm:$0xff]  ;;  %v307_v31 = vld [vmem:[%s841_s30 + $0x18] sm:$0xff]  ;;  %s410_s7 = sshll.u32 %s281_s15, 4  ;;  %s397_s12 = scalar_lea.sflag [#allocation4], %s832_s26  ;;  %s866_s7 = int_to_ptr.vmem [resolvable:$true] %s410_s7 }
  0x52   : > { %s634_s19 = scalar_lea.vmem %s866_s7, 1024  ;;  %s732_s6 = smov [#allocation7]  }
  0x53   : > { %vm313_vm0 = vcmp.lt.s32.totalorder %v310_v1, 2  ;;  %p635_p2 = scmp.ne.s32.totalorder %s866_s7, %s634_s19  ;;  %s638_s18 = sshll.u32 %s732_s6, 4  ;;  %s639_s18 = int_to_ptr.vmem [resolvable:$false] %s638_s18 }
  0x54   : > { %v316_v6 = vsel %vm313_vm0, %v300_v2, 0.0  ;;  %v317_v7 = vsel %vm313_vm0, %v301_v3, 0.0  ;;  %v318_v8 = vsel %vm313_vm0, %v302_v4, 0.0  ;;  %v319_v9 = vsel %vm313_vm0, %v303_v5, 0.0  ;;  %s640_s20 = scalar_lea.vmem %s639_s18, 2048  ;;  %p641_p5 = scmp.lt.s32.totalorder %s866_s7, %s639_s18 }
  0x55   : > { %v324_v10 = vmax.f32 %v316_v6, %v317_v7  ;;  %v325_v11 = vmax.f32 %v318_v8, %v319_v9  ;;  %v320_v32 = vsel %vm313_vm0, %v304_v28, 0.0  ;;  %v321_v33 = vsel %vm313_vm0, %v305_v29, 0.0  ;;  %p636_p3 = pnand %p635_p2, %p801_p9  ;;  %p642_p6 = scmp.lt.s32.totalorder %s640_s20, %s634_s19 }
  0x56   : > { %v322_v34 = vsel %vm313_vm0, %v306_v30, 0.0  ;;  %v323_v35 = vsel %vm313_vm0, %v307_v31, 0.0  ;;  %v355_v41 = vmul.f32 %v320_v32, %v320_v32  ;;  %v356_v42 = vmul.f32 %v321_v33, %v321_v33 }
  0x57   : > { %v326_v12 = vmax.f32 %v324_v10, %v325_v11  ;;  %v357_v43 = vmul.f32 %v322_v34, %v322_v34  ;;  %v358_v44 = vmul.f32 %v323_v35, %v323_v35  ;;  %p637_p4 = pneg %p636_p3  ;;  %p643_p7 = por %p642_p6, %p641_p5 }
  0x59   : > { %v327_v13 = vsub.f32 %v316_v6, %v326_v12  ;;  %v328_v14 = vsub.f32 %v317_v7, %v326_v12  ;;  %v329_v15 = vsub.f32 %v318_v8, %v326_v12  ;;  %v330_v16 = vsub.f32 %v319_v9, %v326_v12  ;;  %p644_p8 = pnand %p643_p7, %p637_p4 }
  0x5b   : > { %v331_v17 = vmul.f32 1.442695, %v327_v13  ;;  %v333_v18 = vmul.f32 1.442695, %v328_v14  ;;  %v335_v19 = vmul.f32 1.442695, %v329_v15 }
  0x5c   : > { %v337_v20 = vmul.f32 1.442695, %v330_v16 }
  0x5d   : > { %624 = vpow2.f32 %v331_v17 }
  0x5e   : > { %626 = vpow2.f32 %v333_v18 }
  0x5f   : > { %628 = vpow2.f32 %v335_v19 }
  0x60   : > { %630 = vpow2.f32 %v337_v20 }
  0x67   : > { %v625_v21 = vpop.eup %624 }
  0x68   : > { %v627_v22 = vpop.eup %626 }
  0x69   : > { %v629_v23 = vpop.eup %628  ;;  %v339_v24 = vadd.f32 %v627_v22, %v625_v21 }
  0x6a   : > { %v631_v25 = vpop.eup %630 }
  0x6b   : > { %v340_v26 = vadd.f32 %v629_v23, %v339_v24 }
  0x6d   : > { %v341_v27 = vadd.f32 %v631_v25, %v340_v26 }
  0x6f   : > { %632 = vrcp.f32 %v341_v27 }
  0x79   : > { %v633_v36 = vpop.eup %632 }
  0x7a   : > { %v343_v37 = vmul.f32 %v633_v36, %v625_v21  ;;  %v344_v38 = vmul.f32 %v633_v36, %v627_v22  ;;  %v345_v39 = vmul.f32 %v633_v36, %v629_v23  ;;  %v346_v40 = vmul.f32 %v633_v36, %v631_v25 }
  0x7c   : > { %v347_v45 = vmul.f32 %v343_v37, %v320_v32  ;;  %v348_v46 = vmul.f32 %v344_v38, %v321_v33  ;;  %v349_v47 = vmul.f32 %v345_v39, %v322_v34  ;;  %v350_v48 = vmul.f32 %v346_v40, %v323_v35 }
  0x7d   : > { %v351_v49 = vmul.f32 %v343_v37, %v343_v37  ;;  %v352_v50 = vmul.f32 %v344_v38, %v344_v38  ;;  %v353_v51 = vmul.f32 %v345_v39, %v345_v39  ;;  %v354_v52 = vmul.f32 %v346_v40, %v346_v40 }
  0x7e   : > { %379 = vst [vmem:[%s281_s15] sm:$0xff] %v347_v45  ;;  %380 = vst [vmem:[%s281_s15 + $0x8] sm:$0xff] %v348_v46 }
  0x7f   : > { %v359_v53 = vadd.f32 %v355_v41, %v351_v49  ;;  %v360_v54 = vadd.f32 %v356_v42, %v352_v50  ;;  %v361_v55 = vadd.f32 %v357_v43, %v353_v51  ;;  %v362_v56 = vadd.f32 %v358_v44, %v354_v52  ;;  %381 = vst [vmem:[%s281_s15 + $0x10] sm:$0xff] %v349_v47 }
  0x80   : > { %382 = vst [vmem:[%s281_s15 + $0x18] sm:$0xff] %v350_v48 }
  0x81   : > { %542 = vst [vmem:[%s281_s15 + $0x20] sm:$0xff] %v359_v53  ;;  %543 = vst [vmem:[%s281_s15 + $0x28] sm:$0xff] %v360_v54 }
  0x82   : > { %544 = vst [vmem:[%s281_s15 + $0x30] sm:$0xff] %v361_v55  ;;  %545 = vst [vmem:[%s281_s15 + $0x38] sm:$0xff] %v362_v56 }
  0x83   : > { %647 = shalt.err (!%p644_p8)
}
  0x84   : > { %s648_s25 = scalar_lea.hbm %s864_s5, 1024  ;;  %s652_s4 = scalar_lea.hbm %s917_s2, 2048 }
  0x85   : > { %p649_p10 = scmp.ne.s32.totalorder %s864_s5, %s648_s25  ;;  %p653_p1 = scmp.lt.u32.totalorder %s864_s5, %s917_s2 }
  0x86   : > { %p654_p2 = scmp.lt.u32.totalorder %s652_s4, %s648_s25  ;;  %p656_p4 = scmp.lt.u32.totalorder %s648_s25, %s864_s5 }
  0x87   : > { %p650_p13 = pnand %p649_p10, %p801_p9 }
  0x88   : > { %p655_p3 = por %p654_p2, %p653_p1 }
  0x89   : > { %p651_p0 = pneg %p650_p13 }
  0x8a   : > { %p657_p5 = por %p656_p4, %p655_p3 }
  0x8c   : > { %p658_p6 = pnand %p657_p5, %p651_p0 }
  0x8e   : > { %661 = shalt.err (!%p658_p6)
}
  0x8f   : > { %s733_s21 = smov 128   ;;  %s734_s8 = smov 8  }
  0x90   : > { %556 = dma.vmem_to_hbm [thread:$0]  (%p801_p9), %s866_s7, 1024, %s864_s5, %s397_s12, %s733_s21, %s733_s21, %s734_s8  }
  0x91 PF: > { %s425_s15 = sand.u32 1, %s700_s9   ;;  %p559_p7 = pnand %p523_p12, %p808_p11 }
  0x92   : > { %s426_s16 = scalar_lea.sflag [#allocation4], %s425_s15 }
  0x93   : > { %695 = dma.done.wait (!%p559_p7), %s426_s16, 1024  }
  0x94   : > { %697 = vsyncadd (!%p559_p7), %s426_s16, 4294966272  ;;  %s21_s14 = sadd.s32 1, %s720_s14   ;;  %s922_s9 = smov %s704_s10 }
  0x95   : > { %p18_p8 = scmp.ge.s32.totalorder %s21_s14, 4   ;;  %s923_s10 = smov %s708_s11 }
  0x96   : > { %s924_s11 = smov %s806_s23  ;;  %s925_s12 = smov %s716_s13 }
  0x97   : > { %s926_s13 = smov %s928_s17  ;;  %20 = sbr.rel (!%p18_p8) target bundleno = 8 (0x8), region = 101 }
  0x9e   :  { %431 = vsyncpa [#allocation3], 1 }
  0x9f   :  { %433 = vsyncpa [#allocation3 + $0x1], 1 }
  0xa0   :  { %434 = vsyncpa [#allocation6], 1 }
  0xa1   :  { %436 = vsyncpa [#allocation6 + $0x1], 1 }
  0xa2   :  { %437 = vsyncpa [#allocation4], 1 }
  0xa3   :  { %439 = vsyncpa [#allocation4 + $0x1], 1 }

</bundles_post_ra>
